<compile_context>
chip_gen: v5e
topology: v5e:2x2
jax: 0.10.0
libtpu: 0.0.40
codegen_flags: <defaults>
</compile_context>

<pallas_src>
import jax
import jax.numpy as jnp
from jax import lax
from jax.experimental import pallas as pl
from jax.experimental.pallas import tpu as pltpu


# ---------------------------------------------------------------------------
# Fused single-pass kernel (whole HW slab resident per batch element).
# ---------------------------------------------------------------------------
def _fused_kernel(x_ref, wg_ref, bg_ref, wp_ref, bp_ref,
                  wt_ref, bt_ref, wo_ref, bo_ref, o_ref):
    """out = x + Wo @ ((g @ phi^T) @ theta) + bo, with 1/HW pre-folded into wg/bg.

    x_ref/o_ref: (1, C, HW)   wg/wp/wt: (Ci, C)   wo: (C, Ci)   biases: (*, 1)
    """
    x = x_ref[0]                                                                      # (C, HW)
    g = jnp.dot(wg_ref[...], x, preferred_element_type=jnp.float32) + bg_ref[...]     # (Ci, HW)
    p = jnp.dot(wp_ref[...], x, preferred_element_type=jnp.float32) + bp_ref[...]     # (Ci, HW)
    t = jnp.dot(wt_ref[...], x, preferred_element_type=jnp.float32) + bt_ref[...]     # (Ci, HW)
    # m[cg, cp] = sum_k g[cg, k] * phi[cp, k]  (contract the lane/HW axis, no transpose)
    m = lax.dot_general(g, p, (((1,), (1,)), ((), ())),
                        preferred_element_type=jnp.float32)                           # (Ci, Ci)
    y = jnp.dot(m, t, preferred_element_type=jnp.float32)                             # (Ci, HW)
    out = x + jnp.dot(wo_ref[...], y, preferred_element_type=jnp.float32) + bo_ref[...]
    o_ref[0] = out.astype(o_ref.dtype)


# ---------------------------------------------------------------------------
# Two-pass tiled path (large HW fallback).
# ---------------------------------------------------------------------------
def _m_reduce_kernel(x_ref, wg_ref, bg_ref, wp_ref, bp_ref, m_ref):
    """Accumulate m[b] = sum over HW tiles of  g_tile @ phi_tile^T.

    x_ref:  (1, C, tk)   wg/wp: (Ci, C)   bg/bp: (Ci, 1)   m_ref: (1, Ci, Ci)
    The 1/HW dot-product scale is pre-folded into wg/bg by the wrapper.
    """
    @pl.when(pl.program_id(1) == 0)
    def _():
        m_ref[...] = jnp.zeros_like(m_ref)

    x = x_ref[0]                                                                      # (C, tk)
    g = jnp.dot(wg_ref[...], x, preferred_element_type=jnp.float32) + bg_ref[...]     # (Ci, tk)
    p = jnp.dot(wp_ref[...], x, preferred_element_type=jnp.float32) + bp_ref[...]     # (Ci, tk)
    m_ref[0] += lax.dot_general(g, p, (((1,), (1,)), ((), ())),
                                preferred_element_type=jnp.float32)                   # (Ci, Ci)


def _apply_kernel(x_ref, m_ref, wt_ref, bt_ref, wo_ref, bo_ref, o_ref):
    """out_tile = x_tile + Wo @ (m @ (Wt @ x_tile + bt)) + bo   (lane-dense over HW)."""
    x = x_ref[0]                                                                      # (C, tq)
    theta = jnp.dot(wt_ref[...], x, preferred_element_type=jnp.float32) + bt_ref[...]  # (Ci, tq)
    y = jnp.dot(m_ref[0], theta, preferred_element_type=jnp.float32)                  # (Ci, tq)
    out = x + jnp.dot(wo_ref[...], y, preferred_element_type=jnp.float32) + bo_ref[...]  # (C, tq)
    o_ref[0] = out.astype(o_ref.dtype)


def _pick_lane_tile(hw, cap=2048):
    """Largest multiple of 128 that divides hw (capped); falls back to full hw."""
    if hw % 128 != 0:
        return hw
    t = min(cap, hw)
    t -= t % 128
    while hw % t != 0:
        t -= 128
    return t


def non_local_block(x_nchw, params, *, lane_tile_cap=2048,
                    fused_vmem_budget=24 * 1024 * 1024):
    """Non_local_Block forward (dot_product mode) on NCHW input."""
    n, c, h, w = x_nchw.shape
    hw = h * w
    ci = params["wg"].shape[0]
    x_chw = x_nchw.reshape(n, c, hw)          # channel-major: HW on the lane dimension

    # Fold the 1/HW dot-product scale into the g-branch weights (free).
    inv_hw = jnp.float32(1.0 / hw)
    wg = params["wg"] * inv_hw
    bg = (params["bg"] * inv_hw).reshape(ci, 1)
    wp, bp = params["wp"], params["bp"].reshape(ci, 1)
    wt, bt = params["wt"], params["bt"].reshape(ci, 1)
    wo, bo = params["wo"], params["bo"].reshape(c, 1)

    vmem_limit = 32 * 1024 * 1024

    # Rough per-grid-step VMEM footprint of the fused path (double-buffered
    # x/out slabs + the three projection intermediates), in bytes.
    fused_bytes = 4 * hw * (2 * (2 * c) + 3 * ci)

    if fused_bytes <= fused_vmem_budget:
        # ---------------- fused single pass: x read once, out written once ----------------
        rep = lambda shape: pl.BlockSpec(shape, lambda b: (0, 0))
        out_chw = pl.pallas_call(
            _fused_kernel,
            out_shape=jax.ShapeDtypeStruct((n, c, hw), x_chw.dtype),
            grid_spec=pltpu.PrefetchScalarGridSpec(
                num_scalar_prefetch=0,
                grid=(n,),
                in_specs=[
                    pl.BlockSpec((1, c, hw), lambda b: (b, 0, 0)),     # x slab
                    rep((ci, c)), rep((ci, 1)),                        # wg (scaled), bg (scaled)
                    rep((ci, c)), rep((ci, 1)),                        # wp, bp
                    rep((ci, c)), rep((ci, 1)),                        # wt, bt
                    rep((c, ci)), rep((c, 1)),                         # wo, bo
                ],
                out_specs=pl.BlockSpec((1, c, hw), lambda b: (b, 0, 0)),
            ),
            compiler_params=pltpu.CompilerParams(
                dimension_semantics=("parallel",),
                vmem_limit_bytes=vmem_limit),
            cost_estimate=pl.CostEstimate(
                flops=n * hw * (6 * c * ci + 4 * ci * ci),
                transcendentals=0,
                bytes_accessed=4 * (2 * n * c * hw + 4 * ci * c + 3 * ci + c)),
        )(x_chw, wg, bg, wp, bp, wt, bt, wo, bo)
        return out_chw.reshape(n, c, h, w)

    # ---------------- two-pass tiled fallback for large HW ----------------
    tile = _pick_lane_tile(hw, lane_tile_cap)
    n_tiles = hw // tile
    rep2 = lambda shape: pl.BlockSpec(shape, lambda b, t: (0, 0))      # replicated operand

    # Pass 1: m[b] = (g @ phi^T) / HW, accumulated over HW tiles (reduction axis last).
    m = pl.pallas_call(
        _m_reduce_kernel,
        out_shape=jax.ShapeDtypeStruct((n, ci, ci), jnp.float32),
        grid_spec=pltpu.PrefetchScalarGridSpec(
            num_scalar_prefetch=0,
            grid=(n, n_tiles),
            in_specs=[
                pl.BlockSpec((1, c, tile), lambda b, t: (b, 0, t)),    # x tile
                rep2((ci, c)), rep2((ci, 1)),                          # wg (scaled), bg (scaled)
                rep2((ci, c)), rep2((ci, 1)),                          # wp, bp
            ],
            out_specs=pl.BlockSpec((1, ci, ci), lambda b, t: (b, 0, 0)),
        ),
        compiler_params=pltpu.CompilerParams(
            dimension_semantics=("parallel", "arbitrary"),
            vmem_limit_bytes=vmem_limit),
        cost_estimate=pl.CostEstimate(
            flops=n * hw * (4 * c * ci + 2 * ci * ci),
            transcendentals=0,
            bytes_accessed=4 * (n * c * hw + n * ci * ci + 2 * ci * (c + 1))),
    )(x_chw, wg, bg, wp, bp)

    # Pass 2: out = x + Wo @ (m @ (Wt x + bt)) + bo, tiled over HW.
    out_chw = pl.pallas_call(
        _apply_kernel,
        out_shape=jax.ShapeDtypeStruct((n, c, hw), x_chw.dtype),
        grid_spec=pltpu.PrefetchScalarGridSpec(
            num_scalar_prefetch=0,
            grid=(n, n_tiles),
            in_specs=[
                pl.BlockSpec((1, c, tile), lambda b, t: (b, 0, t)),    # x tile
                pl.BlockSpec((1, ci, ci), lambda b, t: (b, 0, 0)),     # m (per batch)
                rep2((ci, c)), rep2((ci, 1)),                          # wt, bt
                rep2((c, ci)), rep2((c, 1)),                           # wo, bo
            ],
            out_specs=pl.BlockSpec((1, c, tile), lambda b, t: (b, 0, t)),
        ),
        compiler_params=pltpu.CompilerParams(
            dimension_semantics=("parallel", "parallel"),
            vmem_limit_bytes=vmem_limit),
        cost_estimate=pl.CostEstimate(
            flops=n * hw * (2 * c * ci + 2 * ci * ci + 2 * ci * c),
            transcendentals=0,
            bytes_accessed=4 * (2 * n * c * hw + n * ci * ci + 2 * ci * c + ci + c)),
    )(x_chw, m, wt, bt, wo, bo)

    return out_chw.reshape(n, c, h, w)


def make_params(key, in_channels, inter_channels=None):
    if inter_channels is None:
        inter_channels = in_channels // 2
        if inter_channels == 0:
            inter_channels = 1
    ks = jax.random.split(key, 8)
    s = 0.1
    # PyTorch Conv2d 1x1 weights, stored as (out_channels, in_channels); biases 1-D.
    return {
        "wg": s * jax.random.normal(ks[0], (inter_channels, in_channels), jnp.float32),
        "bg": s * jax.random.normal(ks[1], (inter_channels,), jnp.float32),
        "wt": s * jax.random.normal(ks[2], (inter_channels, in_channels), jnp.float32),
        "bt": s * jax.random.normal(ks[3], (inter_channels,), jnp.float32),
        "wp": s * jax.random.normal(ks[4], (inter_channels, in_channels), jnp.float32),
        "bp": s * jax.random.normal(ks[5], (inter_channels,), jnp.float32),
        "wo": s * jax.random.normal(ks[6], (in_channels, inter_channels), jnp.float32),
        "bo": s * jax.random.normal(ks[7], (in_channels,), jnp.float32),
    }


def non_local_block_ref(x_nchw, params):
    """Pure-JAX reference mirroring the PyTorch forward (dot_product mode, explicit HWxHW)."""
    n, c, h, w = x_nchw.shape
    hw = h * w
    x_chw = x_nchw.reshape(n, c, hw)
    g = jnp.einsum("oc,nch->noh", params["wg"], x_chw) + params["bg"][None, :, None]    # (N,Ci,HW)
    theta = jnp.einsum("oc,nch->noh", params["wt"], x_chw) + params["bt"][None, :, None]
    phi = jnp.einsum("oc,nch->noh", params["wp"], x_chw) + params["bp"][None, :, None]
    g_tok = jnp.transpose(g, (0, 2, 1))                                                 # (N,HW,Ci)
    theta_tok = jnp.transpose(theta, (0, 2, 1))                                         # (N,HW,Ci)
    pw = jnp.einsum("nqc,nck->nqk", theta_tok, phi) / hw                                # (N,HW,HW)
    y_tok = jnp.einsum("nqk,nkc->nqc", pw, g_tok)                                       # (N,HW,Ci)
    y_chw = jnp.transpose(y_tok, (0, 2, 1))                                             # (N,Ci,HW)
    out = x_chw + jnp.einsum("co,noh->nch", params["wo"], y_chw) + params["bo"][None, :, None]
    return out.reshape(n, c, h, w)


if __name__ == "__main__":
    key = jax.random.PRNGKey(0)
    k_x, k_p = jax.random.split(key)

    N, C, H, W = 2, 4, 16, 16
    x = jax.random.normal(k_x, (N, C, H, W), jnp.float32)
    params = make_params(k_p, C)

    # Fused single-pass path (fits VMEM at these shapes).
    out = jax.block_until_ready(non_local_block(x, params))
    ref = non_local_block_ref(x, params)
    assert out.shape == (N, C, H, W)
    assert jnp.allclose(out, ref, atol=1e-4, rtol=1e-4), float(jnp.max(jnp.abs(out - ref)))

    # Also exercise the two-pass tiled fallback (force it by shrinking the budget).
    out2 = jax.block_until_ready(non_local_block(x, params, fused_vmem_budget=0))
    assert jnp.allclose(out2, ref, atol=1e-4, rtol=1e-4), float(jnp.max(jnp.abs(out2 - ref)))

    print("KERNEL_OK")
</pallas_src>

<mosaic_0001>
module attributes {stable_mosaic.version = 11 : i64} {
  func.func @_fused_kernel(%arg0: i32, %arg1: memref<1x4x256xf32, #tpu.memory_space<vmem>>, %arg2: memref<2x4xf32, #tpu.memory_space<vmem>>, %arg3: memref<2x1xf32, #tpu.memory_space<vmem>>, %arg4: memref<2x4xf32, #tpu.memory_space<vmem>>, %arg5: memref<2x1xf32, #tpu.memory_space<vmem>>, %arg6: memref<2x4xf32, #tpu.memory_space<vmem>>, %arg7: memref<2x1xf32, #tpu.memory_space<vmem>>, %arg8: memref<4x2xf32, #tpu.memory_space<vmem>>, %arg9: memref<4x1xf32, #tpu.memory_space<vmem>>, %arg10: memref<1x4x256xf32, #tpu.memory_space<vmem>>) attributes {dimension_semantics = [#tpu.dimension_semantics<parallel>], iteration_bounds = array<i64: 2>, scalar_prefetch = 0 : i64, scratch_operands = 0 : i64, tpu.core_type = #tpu.core_type<tc>, window_params = [{transform_indices = @transform_0, window_bounds = array<i64: 1, 4, 256>}, {pipeline_mode = #tpu.pipeline_mode<synchronous>, transform_indices = @transform_1, window_bounds = array<i64: 2, 4>}, {pipeline_mode = #tpu.pipeline_mode<synchronous>, transform_indices = @transform_2, window_bounds = array<i64: 2, 1>}, {pipeline_mode = #tpu.pipeline_mode<synchronous>, transform_indices = @transform_3, window_bounds = array<i64: 2, 4>}, {pipeline_mode = #tpu.pipeline_mode<synchronous>, transform_indices = @transform_4, window_bounds = array<i64: 2, 1>}, {pipeline_mode = #tpu.pipeline_mode<synchronous>, transform_indices = @transform_5, window_bounds = array<i64: 2, 4>}, {pipeline_mode = #tpu.pipeline_mode<synchronous>, transform_indices = @transform_6, window_bounds = array<i64: 2, 1>}, {pipeline_mode = #tpu.pipeline_mode<synchronous>, transform_indices = @transform_7, window_bounds = array<i64: 4, 2>}, {pipeline_mode = #tpu.pipeline_mode<synchronous>, transform_indices = @transform_8, window_bounds = array<i64: 4, 1>}, {transform_indices = @transform_9, window_bounds = array<i64: 1, 4, 256>}]} {
    %c0 = arith.constant 0 : index
    %c0_0 = arith.constant 0 : index
    %c0_1 = arith.constant 0 : index
    %0 = vector.load %arg1[%c0, %c0_0, %c0_1] : memref<1x4x256xf32, #tpu.memory_space<vmem>>, vector<1x4x256xf32>
    %1 = vector.shape_cast %0 : vector<1x4x256xf32> to vector<4x256xf32>
    %c0_2 = arith.constant 0 : index
    %c0_3 = arith.constant 0 : index
    %2 = vector.load %arg2[%c0_2, %c0_3] : memref<2x4xf32, #tpu.memory_space<vmem>>, vector<2x4xf32>
    %cst = arith.constant dense<0.000000e+00> : vector<2x256xf32>
    %3 = tpu.matmul %2, %1, %cst {dimension_numbers = #tpu.dot_dimension_numbers<[1], [0], [0], [1], [0, 0, 1, 1], [], []>} : vector<2x4xf32>, vector<4x256xf32>, vector<2x256xf32> -> vector<2x256xf32>
    %c0_4 = arith.constant 0 : index
    %c0_5 = arith.constant 0 : index
    %4 = vector.load %arg3[%c0_4, %c0_5] : memref<2x1xf32, #tpu.memory_space<vmem>>, vector<2x1xf32>
    %5 = vector.broadcast %4 : vector<2x1xf32> to vector<2x256xf32>
    %6 = arith.addf %3, %5 : vector<2x256xf32>
    %c0_6 = arith.constant 0 : index
    %c0_7 = arith.constant 0 : index
    %7 = vector.load %arg4[%c0_6, %c0_7] : memref<2x4xf32, #tpu.memory_space<vmem>>, vector<2x4xf32>
    %cst_8 = arith.constant dense<0.000000e+00> : vector<2x256xf32>
    %8 = tpu.matmul %7, %1, %cst_8 {dimension_numbers = #tpu.dot_dimension_numbers<[1], [0], [0], [1], [0, 0, 1, 1], [], []>} : vector<2x4xf32>, vector<4x256xf32>, vector<2x256xf32> -> vector<2x256xf32>
    %c0_9 = arith.constant 0 : index
    %c0_10 = arith.constant 0 : index
    %9 = vector.load %arg5[%c0_9, %c0_10] : memref<2x1xf32, #tpu.memory_space<vmem>>, vector<2x1xf32>
    %10 = vector.broadcast %9 : vector<2x1xf32> to vector<2x256xf32>
    %11 = arith.addf %8, %10 : vector<2x256xf32>
    %c0_11 = arith.constant 0 : index
    %c0_12 = arith.constant 0 : index
    %12 = vector.load %arg6[%c0_11, %c0_12] : memref<2x4xf32, #tpu.memory_space<vmem>>, vector<2x4xf32>
    %cst_13 = arith.constant dense<0.000000e+00> : vector<2x256xf32>
    %13 = tpu.matmul %12, %1, %cst_13 {dimension_numbers = #tpu.dot_dimension_numbers<[1], [0], [0], [1], [0, 0, 1, 1], [], []>} : vector<2x4xf32>, vector<4x256xf32>, vector<2x256xf32> -> vector<2x256xf32>
    %c0_14 = arith.constant 0 : index
    %c0_15 = arith.constant 0 : index
    %14 = vector.load %arg7[%c0_14, %c0_15] : memref<2x1xf32, #tpu.memory_space<vmem>>, vector<2x1xf32>
    %15 = vector.broadcast %14 : vector<2x1xf32> to vector<2x256xf32>
    %16 = arith.addf %13, %15 : vector<2x256xf32>
    %cst_16 = arith.constant dense<0.000000e+00> : vector<2x2xf32>
    %17 = tpu.matmul %6, %11, %cst_16 {dimension_numbers = #tpu.dot_dimension_numbers<[1], [1], [0], [0], [0, 0, 1, 0], [], []>} : vector<2x256xf32>, vector<2x256xf32>, vector<2x2xf32> -> vector<2x2xf32>
    %cst_17 = arith.constant dense<0.000000e+00> : vector<2x256xf32>
    %18 = tpu.matmul %17, %16, %cst_17 {dimension_numbers = #tpu.dot_dimension_numbers<[1], [0], [0], [1], [0, 0, 1, 1], [], []>} : vector<2x2xf32>, vector<2x256xf32>, vector<2x256xf32> -> vector<2x256xf32>
    %c0_18 = arith.constant 0 : index
    %c0_19 = arith.constant 0 : index
    %19 = vector.load %arg8[%c0_18, %c0_19] : memref<4x2xf32, #tpu.memory_space<vmem>>, vector<4x2xf32>
    %cst_20 = arith.constant dense<0.000000e+00> : vector<4x256xf32>
    %20 = tpu.matmul %19, %18, %cst_20 {dimension_numbers = #tpu.dot_dimension_numbers<[1], [0], [0], [1], [0, 0, 1, 1], [], []>} : vector<4x2xf32>, vector<2x256xf32>, vector<4x256xf32> -> vector<4x256xf32>
    %21 = arith.addf %1, %20 : vector<4x256xf32>
    %c0_21 = arith.constant 0 : index
    %c0_22 = arith.constant 0 : index
    %22 = vector.load %arg9[%c0_21, %c0_22] : memref<4x1xf32, #tpu.memory_space<vmem>>, vector<4x1xf32>
    %23 = vector.broadcast %22 : vector<4x1xf32> to vector<4x256xf32>
    %24 = arith.addf %21, %23 : vector<4x256xf32>
    %c0_23 = arith.constant 0 : index
    %c0_24 = arith.constant 0 : index
    %c0_25 = arith.constant 0 : index
    %25 = vector.load %arg10[%c0_23, %c0_24, %c0_25] : memref<1x4x256xf32, #tpu.memory_space<vmem>>, vector<1x4x256xf32>
    %26 = vector.shape_cast %25 : vector<1x4x256xf32> to vector<4x256xf32>
    %27 = vector.shape_cast %24 : vector<4x256xf32> to vector<1x4x256xf32>
    tpu.vector_store %arg10[%c0_23, %c0_24, %c0_25], %27 {strides = array<i32>} : memref<1x4x256xf32, #tpu.memory_space<vmem>>, vector<1x4x256xf32>,
    return
  }
  func.func @transform_0(%arg0: i32) -> (i32, i32, i32) {
    %c0_i32 = arith.constant 0 : i32
    %c0_i32_0 = arith.constant 0 : i32
    %c0_i32_1 = arith.constant 0 : i32
    return %arg0, %c0_i32, %c0_i32_0 : i32, i32, i32
  }
  func.func @transform_1(%arg0: i32) -> (i32, i32) {
    %c0_i32 = arith.constant 0 : i32
    %c0_i32_0 = arith.constant 0 : i32
    %c0_i32_1 = arith.constant 0 : i32
    return %c0_i32, %c0_i32_0 : i32, i32
  }
  func.func @transform_2(%arg0: i32) -> (i32, i32) {
    %c0_i32 = arith.constant 0 : i32
    %c0_i32_0 = arith.constant 0 : i32
    %c0_i32_1 = arith.constant 0 : i32
    return %c0_i32, %c0_i32_0 : i32, i32
  }
  func.func @transform_3(%arg0: i32) -> (i32, i32) {
    %c0_i32 = arith.constant 0 : i32
    %c0_i32_0 = arith.constant 0 : i32
    %c0_i32_1 = arith.constant 0 : i32
    return %c0_i32, %c0_i32_0 : i32, i32
  }
  func.func @transform_4(%arg0: i32) -> (i32, i32) {
    %c0_i32 = arith.constant 0 : i32
    %c0_i32_0 = arith.constant 0 : i32
    %c0_i32_1 = arith.constant 0 : i32
    return %c0_i32, %c0_i32_0 : i32, i32
  }
  func.func @transform_5(%arg0: i32) -> (i32, i32) {
    %c0_i32 = arith.constant 0 : i32
    %c0_i32_0 = arith.constant 0 : i32
    %c0_i32_1 = arith.constant 0 : i32
    return %c0_i32, %c0_i32_0 : i32, i32
  }
  func.func @transform_6(%arg0: i32) -> (i32, i32) {
    %c0_i32 = arith.constant 0 : i32
    %c0_i32_0 = arith.constant 0 : i32
    %c0_i32_1 = arith.constant 0 : i32
    return %c0_i32, %c0_i32_0 : i32, i32
  }
  func.func @transform_7(%arg0: i32) -> (i32, i32) {
    %c0_i32 = arith.constant 0 : i32
    %c0_i32_0 = arith.constant 0 : i32
    %c0_i32_1 = arith.constant 0 : i32
    return %c0_i32, %c0_i32_0 : i32, i32
  }
  func.func @transform_8(%arg0: i32) -> (i32, i32) {
    %c0_i32 = arith.constant 0 : i32
    %c0_i32_0 = arith.constant 0 : i32
    %c0_i32_1 = arith.constant 0 : i32
    return %c0_i32, %c0_i32_0 : i32, i32
  }
  func.func @transform_9(%arg0: i32) -> (i32, i32, i32) {
    %c0_i32 = arith.constant 0 : i32
    %c0_i32_0 = arith.constant 0 : i32
    %c0_i32_1 = arith.constant 0 : i32
    return %arg0, %c0_i32, %c0_i32_0 : i32, i32, i32
  }
}

</mosaic_0001>

<bundles_post_ra>
// kernel: tpu_custom_call.1
= control target key start
LH: loop header
LB: loop body
LE: loop exit
PB: predicated region body
PF: predicated region fallthrough
CT: control target
= control target key end

     0   :  { %14 = vsyncpa [#allocation3], 0  ;;  %s1062_s0 = inlined_call_operand.vmem [shape: f32[2,4,256], index: 0, kind: input, shape index: {}]   ;;  %s1063_s1 = inlined_call_operand.vmem [shape: f32[2,4], index: 1, kind: input, shape index: {}]   ;;  %s1064_s2 = inlined_call_operand.vmem [shape: f32[2,1], index: 2, kind: input, shape index: {}]   ;;  %s1065_s3 = inlined_call_operand.vmem [shape: f32[2,4], index: 3, kind: input, shape index: {}]   ;;  %s1066_s4 = inlined_call_operand.vmem [shape: f32[2,1], index: 4, kind: input, shape index: {}]   ;;  %s1067_s5 = inlined_call_operand.vmem [shape: f32[2,4], index: 5, kind: input, shape index: {}]   ;;  %s1068_s6 = inlined_call_operand.vmem [shape: f32[2,1], index: 6, kind: input, shape index: {}]   ;;  %s1069_s7 = inlined_call_operand.vmem [shape: f32[4,2], index: 7, kind: input, shape index: {}]   ;;  %s1070_s8 = inlined_call_operand.vmem [shape: f32[4,1], index: 8, kind: input, shape index: {}]   ;;  %s1071_s9 = inlined_call_operand.hbm [shape: f32[2,4,256], index: 9, kind: output, shape index: {}]  }
   0x1   :  { %16 = vsyncpa [#allocation3 + $0x1], 0  ;;  %s934_s30 = smov 0   ;;  %s936_s10 = smov 0  }
   0x2   :  { %s938_s11 = smov 0   ;;  %s940_s12 = smov 0  }
   0x3 LB: > { %s955_s13 = sadd.s32 4294967295, %s880_s12   ;;  %s741_s14 = sadd.s32 4294967294, %s880_s12   ;;  %s880_s12 = sphi %s940_s12, %s1077_s12   ;;  %s876_s11 = sphi %s938_s11, %s1076_s11   ;;  %s872_s10 = sphi %s936_s10, %s1075_s10   ;;  %s868_s30 = sphi %s934_s30, %s1074_s30  }
   0x4   : > { %s959_s15 = sadd.s32 1, %s880_s12   ;;  %s223_s16 = sadd.s32 1, %s876_s11 }
   0x5   : > { %s220_s17 = ssub.s32 %s880_s12, %s959_s15  ;;  %p233_p0 = scmp.ne.s32.totalorder %s876_s11, %s872_s10 }
   0x6   : > { %p221_p1 = scmp.eq.s32.totalorder %s220_s17, 0  ;;  %p234_p2 = scmp.eq.s32.totalorder %s955_s13, 1 }
   0x7   : > { %p239_p3 = scmp.ne.s32.totalorder %s872_s10, %s868_s30  ;;  %p240_p4 = scmp.eq.s32.totalorder %s741_s14, 1 }
   0x8   : > { %s970_s18 = scalar_select %p221_p1, %s876_s11, %s223_s16  }
   0x9   : > { %p972_p5 = por %p234_p2, %p233_p0  ;;  %p976_p6 = por %p240_p4, %p239_p3 }
   0xa   : > { %p744_p7 = scmp.ge.s32.totalorder %s880_s12, 1  ;;  %p290_p8 = scmp.lt.s32.totalorder %s880_s12, 3 }
   0xc   : > { %p291_p9 = pnand %p744_p7, %p290_p8 }
   0xd   : > { %p326_p10 = scmp.lt.s32.totalorder (!%p291_p9), %s955_s13, 1  ;;  %s323_s14 = sand.u32 (!%p291_p9), 1, %s872_s10  }
   0xe   : > { %294 = sbr.rel (%p291_p9) target bundleno = 581 (0x245), region = 56  ;;  %s745_s16 = sshll.u32 (!%p291_p9), %s323_s14, 3 }
   0xf   : > { %s774_s17 = sshll.u32 (!%p291_p9), %s955_s13, 3 }
  0x13   : > { %v882_v0 = vmov 0   ;;  %v393_v1 = vld [vmem:[%s1066_s4] sm:$0x3]  ;;  %s327_s23 = scalar_select %p326_p10, %s955_s13, 1  ;;  %vm347_vm0 = vcmask 1043456   ;;  %vm343_vm1 = vcmask 31744  }
  0x14   : > { %816 = vset.pattern.permute.xlu0 %v882_v0  ;;  %817 = vset.pattern.permute.xlu1 %v882_v0  ;;  %v333_v3 = vld [vmem:[%s1064_s2] sm:$0x3]  ;;  %vm550_vm2 = vcmask 1041408   ;;  %vm546_vm3 = vcmask 15360   ;;  %v883_v36 = vmov 839922192  }
  0x15   : > { %396 = vperm.xlu0 %816, %v393_v1   ;;  %s773_s24 = sshll.u32 %s327_s23, 3  ;;  %v332_v4 = vld [vmem:[%s1063_s1] sm:$0x3]  ;;  %v659_v37 = vunpack.c.l.s4 %v883_v36  ;;  %s677_s23 = scalar_lea.hbm %s1071_s9, %s774_s17 }
  0x16   : > { %s330_s27 = scalar_lea.vmem %s1062_s0, %s773_s24  ;;  %v392_v7 = vld [vmem:[%s1065_s3] sm:$0x3]  ;;  %s325_s24 = scalar_lea.vmem [#allocation2], %s745_s16 }
  0x17   : > { %v990_v2 = vld [vmem:[%s330_s27] sm:$0xff]  ;;  %v660_v38 = vunpack.c.0.s8 %v659_v37  ;;  %s679_s25 = sshll.u32 %s325_s24, 4  ;;  %s681_s26 = sshll.u32 %s677_s23, 4  ;;  %s680_s25 = int_to_ptr.vmem [resolvable:$true] %s679_s25  ;;  %s682_s26 = int_to_ptr.hbm [resolvable:$true] %s681_s26 }
  0x18   : > { %340 = vst [vmem:[#allocation1] ss:$2 sm:$0xff] %v990_v2  ;;  %v449_v12 = vld [vmem:[%s1067_s5] sm:$0x3]  ;;  %s666_s13 = scalar_lea.sflag [#allocation3], %s323_s14  ;;  %s832_s27 = sshra.s32 %s682_s26, 4  ;;  %s833_s27 = int_to_ptr.hbm [resolvable:$true] %s832_s27 }
  0x19   : > { %v450_v13 = vld [vmem:[%s1068_s6] sm:$0x3]  ;;  %s834_s28 = scalar_lea.hbm %s833_s27, 8  ;;  %s838_s16 = scalar_lea.hbm %s1071_s9, 16 }
  0x1a   : > { %453 = vperm.xlu1 %817, %v450_v13   ;;  %v653_v14 = vld [vmem:[%s1070_s8] sm:$0xf]  ;;  %p835_p11 = scmp.ne.s32.totalorder %s833_s27, %s834_s28  ;;  %p839_p0 = scmp.lt.s32.totalorder %s833_s27, %s1071_s9 }
  0x1b   : > { %v597_v33 = vld [vmem:[%s1069_s7] sm:$0xf]  ;;  %p840_p1 = scmp.lt.s32.totalorder %s838_s16, %s834_s28 }
  0x1c   : > { %p836_p12 = pnand %p835_p11, %p972_p5 }
  0x1d   : > { %336 = vperm.xlu0 %816, %v333_v3   ;;  %p841_p2 = por %p840_p1, %p839_p0 }
  0x1e   : > { %p837_p13 = pneg %p836_p12 }
  0x1f   : > { %v341_v5 = vld.sshfl [vmem:[#allocation1] sm:$0xff pattern:$0x75316420]  ;;  %v342_v6 = vld.sshfl [vmem:[#allocation1 + $0x8] sm:$0xff pattern:$0x75316420] }
  0x20   : > { %399 = vst [vmem:[#allocation1] ss:$2 sm:$0xff] %v990_v2  ;;  %748 = vmatpush.msk.msra.mxu0 %vm347_vm0, %v341_v5  ;;  %750 = vmatpush.msk.msra.mxu1 %vm347_vm0, %v342_v6  ;;  %p842_p3 = pnand %p841_p2, %p837_p13 }
  0x21   : > { %749 = vmatmul.msk.f32.vlgmr.msra.gmra.mxu0 %vm343_vm1, %v332_v4  ;;  %751 = vmatmul.msk.f32.vlgmr.msra.gmra.mxu1 %vm343_vm1, %v332_v4 }
  0x22   : > { %656 = vperm.xlu1 %817, %v653_v14  }
  0x27   : > { %v400_v8 = vld.sshfl [vmem:[#allocation1] sm:$0xff pattern:$0x75316420]  ;;  %v401_v9 = vld.sshfl [vmem:[#allocation1 + $0x8] sm:$0xff pattern:$0x75316420] }
  0x28   : > { %752 = vmatpush.msk.msra.mxu2 %vm347_vm0, %v400_v8  ;;  %754 = vmatpush.msk.msra.mxu3 %vm347_vm0, %v401_v9  ;;  %456 = vst [vmem:[#allocation1] ss:$2 sm:$0xff] %v990_v2 }
  0x29   : > { %753 = vmatmul.msk.f32.vlgmr.msra.gmra.mxu2 %vm343_vm1, %v392_v7  ;;  %755 = vmatmul.msk.f32.vlgmr.msra.gmra.mxu3 %vm343_vm1, %v392_v7 }
  0x2f   : > { %v457_v10 = vld.sshfl [vmem:[#allocation1] sm:$0xff pattern:$0x75316420]  ;;  %v458_v11 = vld.sshfl [vmem:[#allocation1 + $0x8] sm:$0xff pattern:$0x75316420] }
  0x30   : > { %756 = vmatpush.msk.msrb.mxu0 %vm347_vm0, %v457_v10  ;;  %758 = vmatpush.msk.msrb.mxu1 %vm347_vm0, %v458_v11 }
  0x31   : > { %757 = vmatmul.msk.f32.vlgmr.msrb.gmra.mxu0 %vm343_vm1, %v449_v12  ;;  %759 = vmatmul.msk.f32.vlgmr.msrb.gmra.mxu1 %vm343_vm1, %v449_v12 }
  0x87   : > { %v397_v15 = vpop.permute.xlu0 %396 }
  0x8c   : > { %v454_v27 = vpop.permute.xlu1 %453 }
  0x8f   : > { %v337_v16 = vpop.permute.xlu0 %336 }
  0x94   : > { %v657_v41 = vpop.permute.xlu1 %656 }
  0x95   : > { %v661_v44 = vperm.slane %v657_v41, %v660_v38 }
  0x9e   : > { %v369_v19 = vpop.f32.mrf.mxu0  ;;  %v389_v20 = vpop.f32.mrf.mxu1 }
  0x9f   : > { %v370_v23 = vadd.f32 %v369_v19, %v337_v16  ;;  %v390_v24 = vadd.f32 %v389_v20, %v337_v16 }
  0xac   : > { %v426_v17 = vpop.f32.mrf.mxu2  ;;  %v446_v18 = vpop.f32.mrf.mxu3 }
  0xad   : > { %v427_v21 = vadd.f32 %v426_v17, %v397_v15  ;;  %v447_v22 = vadd.f32 %v446_v18, %v397_v15 }
  0xae   : > { %v483_v25 = vpop.f32.mrf.mxu0  ;;  %v503_v26 = vpop.f32.mrf.mxu1 }
  0xaf   : > { %521 = vmatpush.xpose.msrb.mxu2 %v427_v21  ;;  %541 = vmatpush.xpose.msrb.mxu3 %v447_v22  ;;  %v484_v28 = vadd.f32 %v483_v25, %v454_v27  ;;  %v504_v29 = vadd.f32 %v503_v26, %v454_v27 }
  0xb1   : > { %760 = vmatpush.msk.msra.mxu0 %vm550_vm2, %v484_v28  ;;  %762 = vmatpush.msk.msra.mxu1 %vm550_vm2, %v504_v29 }
  0xb2   : > { %522 = vmatmul.f32.vlgmr.msrb.gmra.mxu2 %v370_v23  ;;  %542 = vmatmul.f32.vlgmr.msrb.gmra.mxu3 %v390_v24 }
 0x135   : > { %v523_v30 = vpop.f32.mrf.mxu2  ;;  %v543_v31 = vpop.f32.mrf.mxu3 }
 0x136   : > { %v544_v32 = vadd.f32 %v543_v31, %v523_v30 }
 0x138   : > { %761 = vmatmul.msk.f32.vlgmr.msra.gmra.mxu0 %vm546_vm3, %v544_v32  ;;  %763 = vmatmul.msk.f32.vlgmr.msra.gmra.mxu1 %vm546_vm3, %v544_v32 }
 0x1b5   : > { %v574_v34 = vpop.f32.mrf.mxu0  ;;  %v594_v35 = vpop.f32.mrf.mxu1 }
 0x1b6   : > { %764 = vmatpush.msk.msra.mxu2 %vm550_vm2, %v574_v34  ;;  %766 = vmatpush.msk.msra.mxu3 %vm550_vm2, %v594_v35 }
 0x1b7   : > { %767 = vmatmul.msk.f32.vlgmr.msra.gmra.mxu3 %vm546_vm3, %v597_v33  ;;  %765 = vmatmul.msk.f32.vlgmr.msra.gmra.mxu2 %vm546_vm3, %v597_v33 }
 0x23a   : > { %v644_v39 = vpop.f32.mrf.mxu3  ;;  %v624_v40 = vpop.f32.mrf.mxu2 }
 0x23b   : > { %v649_v42 = vrot.slane %v644_v39, 4 }
 0x23d   : > { %v650_v43 = vsel %vm347_vm0, %v624_v40, %v649_v42 }
 0x23e   : > { %v652_v45 = vadd.f32 %v650_v43, %v990_v2 }
 0x240   : > { %v663_v46 = vadd.f32 %v661_v44, %v652_v45 }
 0x242   : > { %664 = vst [vmem:[%s325_s24] sm:$0xff] %v663_v46 }
 0x243   : > { %845 = shalt.err (!%p842_p3)
}
 0x244   : > { %775 = dma.vmem_to_hbm [thread:$0]  (%p972_p5), %s680_s25, 128, %s682_s26, %s666_s13  }
 0x245 PF: > { %p781_p4 = scmp.ge.s32.totalorder %s880_s12, 2  ;;  %s693_s14 = sand.u32 1, %s868_s30  }
 0x246   : > { %s694_s23 = scalar_lea.sflag [#allocation3], %s693_s14 }
 0x247   : > { %p778_p7 = pnand %p781_p4, %p976_p6 }
 0x249   : > { %p779_p8 = pneg %p778_p7 }
 0x24b   : > { %863 = dma.done.wait (%p779_p8), %s694_s23, 128  }
 0x24c   : > { %865 = vsyncadd (%p779_p8), %s694_s23, 4294967168  ;;  %p19_p9 = scmp.ge.s32.totalorder %s959_s15, 4   ;;  %s1074_s30 = smov %s872_s10 }
 0x24d   : > { %s1075_s10 = smov %s876_s11  ;;  %s1076_s11 = smov %s970_s18 }
 0x24e   : > { %s1077_s12 = smov %s959_s15  ;;  %21 = sbr.rel (!%p19_p9) target bundleno = 3 (0x3), region = 91 }
 0x253   :  { %700 = vsyncpa [#allocation3], 1 }
 0x254   :  { %702 = vsyncpa [#allocation3 + $0x1], 1 }

</bundles_post_ra>
